<compile_context>
chip_gen: v7x
topology: tpu7x:2x2x1
jax: 0.10.0
libtpu: 0.0.40
codegen_flags: <defaults>
</compile_context>

<pallas_src>
import jax
import jax.numpy as jnp
from jax.experimental import pallas as pl
from jax.experimental.pallas import tpu as pltpu


def attention_kernel(h_ref, e_ref, w_ref, bv_ref, o_ref):
    # h_ref : [Bt, D]        hidden (batch tile)
    # e_ref : [Bt*S, 2E]     encoder outputs, batch-major, flattened to 2-D
    # w_ref : [D+2E, D]      packed pre-transposed attn weight: [Wh^T ; We^T]
    # bv_ref: [2, D]         row 0 = bias, row 1 = v
    # o_ref : [Bt, S]        softmax attention weights over src_len
    bt, d = h_ref.shape
    s = e_ref.shape[0] // bt

    wh_t = w_ref[:d, :]                  # [D, D]   (static slices of packed weight)
    we_t = w_ref[d:, :]                  # [2E, D]
    bias = bv_ref[0:1, :]                # [1, D]
    v = bv_ref[1:2, :]                   # [1, D]

    # Linear(cat(hidden, enc)) == hidden @ Wh^T + enc @ We^T + b  (bias folded here)
    h_proj = jnp.dot(h_ref[...], wh_t,
                     preferred_element_type=jnp.float32) + bias       # [Bt, D]
    e_proj = jnp.dot(e_ref[...], we_t,
                     preferred_element_type=jnp.float32)              # [Bt*S, D]

    # 3-D view only for the elementwise add / tanh / v-dot.
    energy = jnp.tanh(e_proj.reshape(bt, s, d) + h_proj[:, None, :])  # [Bt, S, D]

    # bmm(v, energy^T) -> scores over src_len
    scores = jnp.sum(energy * v[None, :, :], axis=-1)                 # [Bt, S]

    # softmax over src_len (last / lane axis)
    scores = scores - jnp.max(scores, axis=-1, keepdims=True)
    p = jnp.exp(scores)
    o_ref[...] = p / jnp.sum(p, axis=-1, keepdims=True)


def _batch_tile(b):
    # Largest friendly tile dividing B (keeps blocks (8,128)-compatible once B >= 8).
    for cand in (512, 256, 128, 64, 32, 16, 8):
        if b % cand == 0:
            return cand
    return b


def bahdanau_attention(hidden, encoder_outputs, attn_w, attn_b, v):
    """hidden: [B, dec_hid]; encoder_outputs: [src_len, B, 2*enc_hid] (PyTorch axis order)."""
    S, B, E2 = encoder_outputs.shape
    D = hidden.shape[1]

    # Wrapper-side glue (plain XLA, constant-foldable for parameters):
    e2d = (jnp.transpose(encoder_outputs, (1, 0, 2))          # [B, S, 2E]
           .reshape(B * S, E2).astype(jnp.float32))           # [B*S, 2E]
    w_packed = attn_w.T.astype(jnp.float32)                   # [D+2E, D] == [Wh^T ; We^T]
    bv = jnp.stack([attn_b, v], axis=0).astype(jnp.float32)   # [2, D]

    bt = _batch_tile(B)
    grid = (B // bt,)

    # TODO(synk): for very large S, pad src_len to a multiple of 128 (mask the pad
    # with -inf before softmax) for a lane-dense output store, and size the e-block
    # against v7x's 64 MiB VMEM; at these shapes the full-S block is a single tile.
    return pl.pallas_call(
        attention_kernel,
        out_shape=jax.ShapeDtypeStruct((B, S), jnp.float32),
        grid=grid,
        in_specs=[
            pl.BlockSpec((bt, D), lambda i: (i, 0)),          # hidden tile
            pl.BlockSpec((bt * S, E2), lambda i: (i, 0)),     # encoder rows for this tile
            pl.BlockSpec((D + E2, D), lambda i: (0, 0)),      # packed weights (resident)
            pl.BlockSpec((2, D), lambda i: (0, 0)),           # packed bias / v (resident)
        ],
        out_specs=pl.BlockSpec((bt, S), lambda i: (i, 0)),
        compiler_params=pltpu.CompilerParams(
            dimension_semantics=("parallel",)),
    )(hidden.astype(jnp.float32), e2d, w_packed, bv)


def reference(hidden, encoder_outputs, attn_w, attn_b, v):
    """Pure-JAX reference matching the PyTorch module."""
    S, B = encoder_outputs.shape[0], encoder_outputs.shape[1]
    h_rep = jnp.repeat(hidden[:, None, :], S, axis=1)                   # [B, S, D]
    e = jnp.transpose(encoder_outputs, (1, 0, 2))                       # [B, S, 2E]
    cat = jnp.concatenate([h_rep, e], axis=2)                           # [B, S, D+2E]
    energy = jnp.tanh(jnp.einsum('bsk,dk->bsd', cat, attn_w) + attn_b)  # [B, S, D]
    attention = jnp.einsum('bsd,d->bs', energy, v)                      # [B, S]
    return jax.nn.softmax(attention, axis=1)


if __name__ == "__main__":
    enc_hid_dim = 16
    dec_hid_dim = 32
    batch = 2
    src_len = 8

    key = jax.random.PRNGKey(0)
    k_h, k_e, k_w, k_b, k_v = jax.random.split(key, 5)

    hidden = jax.random.normal(k_h, (batch, dec_hid_dim), dtype=jnp.float32)
    encoder_outputs = jax.random.normal(
        k_e, (src_len, batch, 2 * enc_hid_dim), dtype=jnp.float32)

    # Deterministic parameter init (shapes per nn.Linear(2*enc+dec, dec) and v = rand(dec)).
    in_features = 2 * enc_hid_dim + dec_hid_dim
    bound = 1.0 / (in_features ** 0.5)
    attn_w = jax.random.uniform(k_w, (dec_hid_dim, in_features),
                                minval=-bound, maxval=bound, dtype=jnp.float32)
    attn_b = jax.random.uniform(k_b, (dec_hid_dim,),
                                minval=-bound, maxval=bound, dtype=jnp.float32)
    v_param = jax.random.uniform(k_v, (dec_hid_dim,),
                                 minval=0.0, maxval=1.0, dtype=jnp.float32)

    out = bahdanau_attention(hidden, encoder_outputs, attn_w, attn_b, v_param)
    out = jax.block_until_ready(out)

    ref = reference(hidden, encoder_outputs, attn_w, attn_b, v_param)
    assert out.shape == (batch, src_len)
    assert jnp.allclose(out, ref, atol=1e-5, rtol=1e-5), "mismatch vs pure-JAX reference"

    print("KERNEL_OK")
</pallas_src>

<mosaic_0001>
module attributes {stable_mosaic.version = 11 : i64} {
  func.func @attention_kernel(%arg0: i32, %arg1: memref<2x32xf32, #tpu.memory_space<vmem>>, %arg2: memref<16x32xf32, #tpu.memory_space<vmem>>, %arg3: memref<64x32xf32, #tpu.memory_space<vmem>>, %arg4: memref<2x32xf32, #tpu.memory_space<vmem>>, %arg5: memref<2x8xf32, #tpu.memory_space<vmem>>) attributes {dimension_semantics = [#tpu.dimension_semantics<parallel>], iteration_bounds = array<i64: 1>, scalar_prefetch = 0 : i64, scratch_operands = 0 : i64, tpu.core_type = #tpu.core_type<tc>, window_params = [{transform_indices = @transform_0, window_bounds = array<i64: 2, 32>}, {transform_indices = @transform_1, window_bounds = array<i64: 16, 32>}, {pipeline_mode = #tpu.pipeline_mode<synchronous>, transform_indices = @transform_2, window_bounds = array<i64: 64, 32>}, {pipeline_mode = #tpu.pipeline_mode<synchronous>, transform_indices = @transform_3, window_bounds = array<i64: 2, 32>}, {transform_indices = @transform_4, window_bounds = array<i64: 2, 8>}]} {
    %c0 = arith.constant 0 : index
    %c0_0 = arith.constant 0 : index
    %0 = vector.load %arg3[%c0, %c0_0] : memref<64x32xf32, #tpu.memory_space<vmem>>, vector<32x32xf32>
    %c32 = arith.constant 32 : index
    %c0_1 = arith.constant 0 : index
    %1 = vector.load %arg3[%c32, %c0_1] : memref<64x32xf32, #tpu.memory_space<vmem>>, vector<32x32xf32>
    %c0_2 = arith.constant 0 : index
    %c0_3 = arith.constant 0 : index
    %2 = vector.load %arg4[%c0_2, %c0_3] : memref<2x32xf32, #tpu.memory_space<vmem>>, vector<1x32xf32>
    %c1 = arith.constant 1 : index
    %c0_4 = arith.constant 0 : index
    %3 = vector.load %arg4[%c1, %c0_4] : memref<2x32xf32, #tpu.memory_space<vmem>>, vector<1x32xf32>
    %c0_5 = arith.constant 0 : index
    %c0_6 = arith.constant 0 : index
    %4 = vector.load %arg1[%c0_5, %c0_6] : memref<2x32xf32, #tpu.memory_space<vmem>>, vector<2x32xf32>
    %cst = arith.constant dense<0.000000e+00> : vector<2x32xf32>
    %5 = tpu.matmul %4, %0, %cst {dimension_numbers = #tpu.dot_dimension_numbers<[1], [0], [0], [1], [0, 0, 1, 1], [], []>} : vector<2x32xf32>, vector<32x32xf32>, vector<2x32xf32> -> vector<2x32xf32>
    %6 = vector.broadcast %2 : vector<1x32xf32> to vector<2x32xf32>
    %7 = arith.addf %5, %6 : vector<2x32xf32>
    %c0_7 = arith.constant 0 : index
    %c0_8 = arith.constant 0 : index
    %8 = vector.load %arg2[%c0_7, %c0_8] : memref<16x32xf32, #tpu.memory_space<vmem>>, vector<16x32xf32>
    %cst_9 = arith.constant dense<0.000000e+00> : vector<16x32xf32>
    %9 = tpu.matmul %8, %1, %cst_9 {dimension_numbers = #tpu.dot_dimension_numbers<[1], [0], [0], [1], [0, 0, 1, 1], [], []>} : vector<16x32xf32>, vector<32x32xf32>, vector<16x32xf32> -> vector<16x32xf32>
    %10 = vector.shape_cast %9 : vector<16x32xf32> to vector<2x8x32xf32>
    %11 = vector.shape_cast %7 : vector<2x32xf32> to vector<2x1x32xf32>
    %12 = vector.broadcast %11 : vector<2x1x32xf32> to vector<2x8x32xf32>
    %13 = arith.addf %10, %12 : vector<2x8x32xf32>
    %14 = math.tanh %13 : vector<2x8x32xf32>
    %15 = vector.shape_cast %3 : vector<1x32xf32> to vector<1x1x32xf32>
    %16 = vector.broadcast %15 : vector<1x1x32xf32> to vector<2x8x32xf32>
    %17 = arith.mulf %14, %16 : vector<2x8x32xf32>
    %cst_10 = arith.constant dense<0.000000e+00> : vector<2x8xf32>
    %18 = vector.multi_reduction <add>, %17, %cst_10 [2] : vector<2x8x32xf32> to vector<2x8xf32>
    %cst_11 = arith.constant dense<0xFF800000> : vector<2xf32>
    %19 = vector.multi_reduction <maximumf>, %18, %cst_11 [1] : vector<2x8xf32> to vector<2xf32>
    %20 = vector.shape_cast %19 : vector<2xf32> to vector<2x1xf32>
    %21 = vector.broadcast %20 : vector<2x1xf32> to vector<2x8xf32>
    %22 = arith.subf %18, %21 : vector<2x8xf32>
    %23 = math.exp %22 : vector<2x8xf32>
    %cst_12 = arith.constant dense<0.000000e+00> : vector<2xf32>
    %24 = vector.multi_reduction <add>, %23, %cst_12 [1] : vector<2x8xf32> to vector<2xf32>
    %25 = vector.shape_cast %24 : vector<2xf32> to vector<2x1xf32>
    %26 = vector.broadcast %25 : vector<2x1xf32> to vector<2x8xf32>
    %27 = arith.divf %23, %26 : vector<2x8xf32>
    %c0_13 = arith.constant 0 : index
    %c0_14 = arith.constant 0 : index
    %28 = vector.load %arg5[%c0_13, %c0_14] : memref<2x8xf32, #tpu.memory_space<vmem>>, vector<2x8xf32>
    tpu.vector_store %arg5[%c0_13, %c0_14], %27 {strides = array<i32>} : memref<2x8xf32, #tpu.memory_space<vmem>>, vector<2x8xf32>,
    return
  }
  func.func @transform_0(%arg0: i32) -> (i32, i32) {
    %c0_i32 = arith.constant 0 : i32
    %c0_i32_0 = arith.constant 0 : i32
    return %arg0, %c0_i32 : i32, i32
  }
  func.func @transform_1(%arg0: i32) -> (i32, i32) {
    %c0_i32 = arith.constant 0 : i32
    %c0_i32_0 = arith.constant 0 : i32
    return %arg0, %c0_i32 : i32, i32
  }
  func.func @transform_2(%arg0: i32) -> (i32, i32) {
    %c0_i32 = arith.constant 0 : i32
    %c0_i32_0 = arith.constant 0 : i32
    %c0_i32_1 = arith.constant 0 : i32
    return %c0_i32, %c0_i32_0 : i32, i32
  }
  func.func @transform_3(%arg0: i32) -> (i32, i32) {
    %c0_i32 = arith.constant 0 : i32
    %c0_i32_0 = arith.constant 0 : i32
    %c0_i32_1 = arith.constant 0 : i32
    return %c0_i32, %c0_i32_0 : i32, i32
  }
  func.func @transform_4(%arg0: i32) -> (i32, i32) {
    %c0_i32 = arith.constant 0 : i32
    %c0_i32_0 = arith.constant 0 : i32
    return %arg0, %c0_i32 : i32, i32
  }
}

</mosaic_0001>

<bundles_post_ra>
// kernel: tpu_custom_call.1
= control target key start
LH: loop header
LB: loop body
LE: loop exit
PB: predicated region body
PF: predicated region fallthrough
CT: control target
= control target key end

     0   :  { %v440_v3 = vmov 0.0|0.0   ;;  %vm441_vm0 = vmmov 0   ;;  %v442_v8 = vmov 0.0   ;;  %vm33_vm1 = vcmask 261120   ;;  %s539_s0 = inlined_call_operand.vmem [shape: f32[2,32], index: 0, kind: input, shape index: {}]   ;;  %s540_s1 = inlined_call_operand.vmem [shape: f32[16,32], index: 1, kind: input, shape index: {}]   ;;  %s541_s2 = inlined_call_operand.vmem [shape: f32[64,32], index: 2, kind: input, shape index: {}]   ;;  %s542_s3 = inlined_call_operand.vmem [shape: f32[2,32], index: 3, kind: input, shape index: {}]   ;;  %s543_s4 = inlined_call_operand.hbm [shape: f32[2,8], index: 4, kind: output, shape index: {}]  }
   0x1   :  { %v18_v0 = vld [vmem:[%s541_s2] sm:$0xff]  ;;  %v19_v1 = vld [vmem:[%s541_s2 + $0x8] sm:$0xff]  ;;  %v20_v2 = vld [vmem:[%s541_s2 + $0x10] sm:$0xff]  ;;  %382 = vmatprep.subr.bf16.mxu0 %v440_v3  ;;  %368 = vmatprep.mubr.msk.f32.mxu0 %vm441_vm0, %v442_v8 }
   0x2   :  { %v383_v4 = vpack.c.bf16 %v19_v1, %v18_v0  ;;  %v21_v5 = vld [vmem:[%s541_s2 + $0x18] sm:$0xff]  ;;  %v22_v6 = vld [vmem:[%s541_s2 + $0x20] sm:$0xff]  ;;  %v23_v7 = vld [vmem:[%s541_s2 + $0x28] sm:$0xff] }
   0x3   :  { %v388_v9 = vpack.c.bf16 %v23_v7, %v22_v6  ;;  %v24_v10 = vld [vmem:[%s541_s2 + $0x30] sm:$0xff]  ;;  %v25_v11 = vld [vmem:[%s541_s2 + $0x38] sm:$0xff]  ;;  %v386_v12 = vpack.c.bf16 %v21_v5, %v20_v2  ;;  %v107_v14 = vld [vmem:[%s540_s1] sm:$0xff] }
   0x4   :  { %384 = vmatpush3.bf16.msra.mxu0 %v383_v4  ;;  %v392_v13 = vpack.c.bf16 %v25_v11, %v24_v10 }
   0x5   :  { %385 = vmatprep.subr.bf16.mxu0 %v440_v3  ;;  %389 = vmatprep.subr.bf16.mxu1 %v388_v9 }
   0x6   :  { %9 = vsyncpa [#allocation3], 0  ;;  %391 = vmatpush3.bf16.msra.mxu1 %v388_v9  ;;  %379 = vmatprep.mubr.msk.f32.mxu1 %vm33_vm1, %v107_v14  ;;  %v28_v15 = vld [vmem:[%s539_s0] sm:$0x3]  ;;  %v108_v16 = vld [vmem:[%s540_s1 + $0x8] sm:$0xff]  ;;  %v194_v19 = vlaneseq  ;;  %vm251_vm2 = vcmask 1041409  }
   0x7   :  { %393 = vmatprep.subr.bf16.mxu1 %v392_v13  ;;  %v443_v17 = vmov 1966171168   ;;  %v344_v22 = vld [vmem:[%s542_s3] ss:$0 sm:$0xff]  ;;  %v348_v38 = vld [vmem:[%s542_s3 + $0x1] ss:$0 sm:$0xff] }
   0x8   :  { %387 = vmatpush3.bf16.msra.mxu0 %v386_v12  ;;  %v192_v18 = vunpack.c.l.s4 %v443_v17  ;;  %v507_v21 = vshrl.u32 %v194_v19, 7  ;;  %v242_v45 = vand.u32 127, %v194_v19  ;;  %vm254_vm3 = vcmask 58368   ;;  %s445_s3 = smov [#allocation2]  }
   0x9   :  { %v444_v53 = vmov 0   ;;  %s336_s12 = sshll.u32 %s445_s3, 4  ;;  %s337_s12 = int_to_ptr.vmem [resolvable:$true] %s336_s12 }
   0xa   :  { %395 = vmatpush3.bf16.msra.mxu1 %v392_v13  ;;  %v193_v20 = vunpack.c.0.s8 %v192_v18  ;;  %v215_v29 = vsub.s32 0, %v507_v21  ;;  %v245_v47 = vsub.s32 %v242_v45, %v507_v21  ;;  %403 = vset.pattern.permute.xlu0 %v444_v53  ;;  %v265_v54 = vsub.s32 1, %v507_v21  ;;  %s416_s13 = scalar_lea.vmem %s337_s12, 32  ;;  %p421_p1 = scmp.lt.s32.totalorder %s337_s12, %s337_s12 }
   0xb   :  { %369 = vmatmul.mubr.msk.f32.vlgmr.msra.gmra.mrb[0].mxu0 %vm33_vm1, %v28_v15  ;;  %402 = vset.pattern.permute.xlu1 %v444_v53  ;;  %p417_p0 = scmp.ne.s32.totalorder %s337_s12, %s416_s13  ;;  %p422_p2 = scmp.lt.s32.totalorder %s416_s13, %s416_s13 }
   0xc   :  { %v196_v23 = vsub.s32 %v193_v20, %v507_v21 }
   0xd   :  { %380 = vmatmul.mubr.msk.f32.vlgmr.msra.gmra.mrb[0].mxu1 %vm33_vm1, %v108_v16  ;;  %p423_p3 = por %p422_p2, %p421_p1 }
   0xf   :  { %p424_p4 = pnand %p423_p3, %p417_p0 }
  0xde   :  { %v103_v24 = vpop.f32.mrb[0].mxu0 }
  0xdf   :  { %v104_v25 = vadd.f32 %v344_v22, %v103_v24  ;;  %v370_v26 = vpop.f32.mrb[1].mxu0 }
  0xe0   :  { %v381_v27 = vpop.f32.mrb[0].mxu1 }
  0xe1   :  { %v197_v28 = vrot.slane %v104_v25, %v196_v23  ;;  %v181_v30 = vpop.f32.mrb[1].mxu1 }
  0xe3   :  { %v198_v31 = vcombine.high %v197_v28, %v197_v28  ;;  %v205_v32 = vrot.slane %v197_v28, %v196_v23 }
  0xe5   :  { %v212_v33 = vrot.slane %v198_v31, %v196_v23  ;;  %v216_v34 = vrot.slane %v205_v32, %v215_v29 }
  0xe7   :  { %v220_v35 = vrot.slane %v212_v33, %v215_v29  ;;  %v223_v36 = vadd.f32 %v216_v34, %v181_v30 }
  0xe9   :  { %v224_v37 = vadd.f32 %v381_v27, %v220_v35  ;;  %404 = vtanh.f32 %v223_v36 }
  0xeb   :  { %406 = vtanh.f32 %v224_v37 }
  0xf3   :  { %v405_v39 = vpop.eup %404 }
  0xf4   :  { %v231_v40 = vmul.f32 %v405_v39, %v348_v38 }
  0xf5   :  { %v407_v41 = vpop.eup %406 }
  0xf6   :  { %v233_v42 = vsel %vm33_vm1, %v231_v40, 0.0  ;;  %v232_v43 = vmul.f32 %v407_v41, %v348_v38 }
  0xf7   :  { %234 = vadd.xlane.f32.xlu0 %v233_v42 }
  0xf8   :  { %v236_v44 = vsel %vm33_vm1, %v232_v43, 0.0 }
  0xfb   :  { %237 = vadd.xlane.f32.xlu0 %v236_v44 }
 0x184   :  { %v235_v46 = vpop.xlane.xlu0 %234 }
 0x185   :  { %v246_v49 = vrot.slane %v235_v46, %v245_v47 }
 0x188   :  { %v238_v48 = vpop.xlane.xlu0 %237 }
 0x189   :  { %v250_v50 = vrot.slane %v238_v48, %v245_v47 }
 0x18b   :  { %v252_v51 = vsel %vm251_vm2, %v250_v50, %v246_v49 }
 0x18c   :  { %v255_v52 = vsel %vm254_vm3, %v252_v51, -inf }
 0x18d   :  { %256 = vmax.xlane.f32.xlu1 %v255_v52 }
 0x21a   :  { %v257_v55 = vpop.xlane.xlu1 %256 }
 0x21b   :  { %v262_v56 = vrot.slane %v257_v55, %v215_v29  ;;  %v266_v57 = vrot.slane %v257_v55, %v265_v54 }
 0x21d   :  { %v269_v58 = vsub.f32 %v235_v46, %v262_v56  ;;  %v270_v59 = vsub.f32 %v238_v48, %v266_v57 }
 0x21f   :  { %v271_v60 = vmul.f32 1.442695, %v269_v58  ;;  %v273_v61 = vmul.f32 1.442695, %v270_v59 }
 0x221   :  { %408 = vpow2.f32 %v271_v60 }
 0x222   :  { %410 = vpow2.f32 %v273_v61 }
 0x22b   :  { %v409_v62 = vpop.eup %408 }
 0x22c   :  { %v411_v63 = vpop.eup %410  ;;  %278 = vperm.xlu1 %402, %v409_v62  }
 0x22d   :  { %281 = vperm.xlu0 %403, %v411_v63  }
 0x2ab   :  { %v279_v0 = vpop.permute.xlu1 %278 }
 0x2ac   :  { %v282_v1 = vpop.permute.xlu0 %281  ;;  %v286_v2 = vrot.slane %v279_v0, %v245_v47 }
 0x2ad   :  { %v290_v3 = vrot.slane %v282_v1, %v245_v47 }
 0x2af   :  { %v291_v4 = vsel %vm251_vm2, %v290_v3, %v286_v2 }
 0x2b0   :  { %v293_v5 = vsel %vm254_vm3, %v291_v4, 0.0 }
 0x2b1   :  { %294 = vadd.xlane.f32.xlu1 %v293_v5 }
 0x33e   :  { %v295_v6 = vpop.xlane.xlu1 %294 }
 0x33f   :  { %v300_v7 = vrot.slane %v295_v6, %v215_v29  ;;  %v304_v8 = vrot.slane %v295_v6, %v265_v54 }
 0x341   :  { %412 = vrcp.f32 %v300_v7 }
 0x342   :  { %414 = vrcp.f32 %v304_v8 }
 0x34b   :  { %v413_v9 = vpop.eup %412 }
 0x34c   :  { %v308_v10 = vmul.f32 %v413_v9, %v409_v62  ;;  %v415_v11 = vpop.eup %414 }
 0x34d   :  { %v310_v12 = vmul.f32 %v415_v11, %v411_v63 }
 0x34e   :  { %314 = vperm.xlu0 %403, %v308_v10  }
 0x352   :  { %317 = vperm.xlu0 %403, %v310_v12  }
 0x3cd   :  { %v315_v13 = vpop.permute.xlu0 %314 }
 0x3ce   :  { %v322_v15 = vrot.slane %v315_v13, %v245_v47 }
 0x3d1   :  { %v318_v14 = vpop.permute.xlu0 %317 }
 0x3d2   :  { %v326_v16 = vrot.slane %v318_v14, %v245_v47 }
 0x3d4   :  { %v327_v17 = vsel %vm251_vm2, %v326_v16, %v322_v15 }
 0x3d5   :  { %329 = vst.msk [vmem:[#allocation2] sm:$0x3] %vm254_vm3, %v327_v17 }
 0x3d6   :  { %427 = shalt.err (!%p424_p4)
}
 0x3d7   :  { %s428_s16 = scalar_lea.hbm %s543_s4, 32 }
 0x3d8   :  { %p429_p5 = scmp.ne.s32.totalorder %s543_s4, %s428_s16  ;;  %p432_p6 = scmp.lt.u32.totalorder %s428_s16, %s543_s4 }
 0x3da   :  { %p434_p7 = pnand %p432_p6, %p429_p5 }
 0x3dc   :  { %437 = shalt.err (!%p434_p7)
}
 0x3dd   :  { %339 = dma.vmem_to_hbm [thread:$0]  %s337_s12, 32, %s543_s4, [#allocation3]  }
 0x3de   :  { %438 = dma.done.wait [#allocation3], 32  }
 0x3df   :  { %439 = vsyncadd [#allocation3], 4294967264 }
 0x3e0   :  { %343 = vsyncpa [#allocation3], 1 }

</bundles_post_ra>
